<compile_context>
chip_gen: v5e
topology: v5e:2x2
jax: 0.10.0
libtpu: 0.0.40
codegen_flags: <defaults>
</compile_context>

<pallas_src>
import functools

import jax
import jax.numpy as jnp
from jax.experimental import pallas as pl
from jax.experimental.pallas import tpu as pltpu


# ---------------------------------------------------------------------------
# Kernel
# ---------------------------------------------------------------------------
# Parameter slab layout:
#   small [8, 128] f32 : row 0 = b1 (lanes 0:16), row 1 = b2 (0:32),
#                        row 2 = b3 (0:64), row 3 = b4 (0:128), rows 4:8 = pad.
#   big [512, 128] bf16: rows   0:16  = W1 zero-padded (valid block  3x16),
#                        rows 128:256 = W2 zero-padded (valid block 16x32),
#                        rows 256:384 = W3 zero-padded (valid block 32x64),
#                        rows 384:512 = W4 zero-padded (valid block 64x128).
#   (block offsets are multiples of the bf16 (16,128) sublane tile)
def encoder_kernel(x_ref, small_ref, big_ref, out_ref, acc_ref, *,
                   n_total, n_padded, steps, num_chunks):
    c = pl.program_id(0)          # parallel chunk axis (megacore on v7x)
    i = pl.program_id(1)          # reduction axis over point tiles

    # Init the running [8,128] sum of relu(h3) at the start of each chunk.
    @pl.when(i == 0)
    def _():
        acc_ref[...] = jnp.zeros_like(acc_ref)

    x = x_ref[...]                # [tile_n, 16] bf16 (cols 3:16 are zero padding)
    small = small_ref[...]        # [8, 128] f32 bias rows

    # fc1 on the MXU: [tile_n,16] x [16,128] bf16, f32 accumulate, bias, relu.
    h = jnp.dot(x, big_ref[0:16, :], preferred_element_type=jnp.float32)
    h = jnp.maximum(h + small[0:1, :], 0.0)          # lanes 16.. stay 0

    # fc2: [tile_n,128] x [128,128] (valid 16x32).
    h = jnp.dot(h.astype(jnp.bfloat16), big_ref[128:256, :],
                preferred_element_type=jnp.float32)
    h = jnp.maximum(h + small[1:2, :], 0.0)          # lanes 32.. stay 0

    # fc3: [tile_n,128] x [128,128] (valid 32x64).
    h = jnp.dot(h.astype(jnp.bfloat16), big_ref[256:384, :],
                preferred_element_type=jnp.float32)
    h = jnp.maximum(h + small[2:3, :], 0.0)          # lanes 64.. stay 0

    tile_n = h.shape[0]

    # Mask zero-padded points (they would otherwise add relu(b*) garbage).
    if n_padded != n_total:                          # static (trace-time) check
        base = (c * steps + i) * tile_n
        rows = jax.lax.broadcasted_iota(jnp.int32, (tile_n, 128), 0) + base
        h = jnp.where(rows < n_total, h, 0.0)

    # Accumulate into a full vreg: pure leading-dim VALU adds, no XLU reduce.
    acc_ref[...] += jnp.sum(h.reshape(tile_n // 8, 8, 128), axis=0)

    # Finalize this chunk: scale by 1/N and apply the affine fc4 per sublane row.
    # (fc4 is affine and the mean is linear, so summing the 8*num_chunks output
    #  rows — each carrying b4/(8*num_chunks) — reproduces fc4(mean) exactly.)
    @pl.when(i == steps - 1)
    def _():
        m = acc_ref[...] * (1.0 / n_total)           # [8,128] f32, lanes 64.. are 0
        part = jnp.dot(m.astype(jnp.bfloat16), big_ref[384:512, :],
                       preferred_element_type=jnp.float32)
        out_ref[0] = part + small[3:4, :] * (1.0 / (8 * num_chunks))


# ---------------------------------------------------------------------------
# Host-side packing + wrapper
# ---------------------------------------------------------------------------
def pack_params(params):
    (w1, b1), (w2, b2), (w3, b3), (w4, b4) = params

    small = jnp.zeros((8, 128), jnp.float32)
    small = small.at[0, 0:16].set(b1.reshape(16))
    small = small.at[1, 0:32].set(b2.reshape(32))
    small = small.at[2, 0:64].set(b3.reshape(64))
    small = small.at[3, 0:128].set(b4.reshape(128))

    big = jnp.zeros((512, 128), jnp.float32)
    big = big.at[0:3, 0:16].set(w1)                  # W1
    big = big.at[128:144, 0:32].set(w2)              # W2
    big = big.at[256:288, 0:64].set(w3)              # W3
    big = big.at[384:448, 0:128].set(w4)             # W4
    return small, big.astype(jnp.bfloat16)


def _round_up(v, m):
    return ((v + m - 1) // m) * m


def encoder_forward(x, params, *, max_tile=4096, num_chunks=2):
    """x: [N, 3] f32 context points -> [1, 128] aggregated r."""
    n = x.shape[0]
    small, big = pack_params(params)

    # Tile selection: multiple of 8, bounded so the streamed x tile (+ f32
    # intermediates) stays comfortably inside 32 MiB of VMEM on any chip (v7x
    # has only 64 MiB physical / 32 MiB scoped default).
    max_tile = max(8, _round_up(max_tile, 8))
    per_chunk = -(-n // num_chunks)                       # ceil
    tile_n = min(max_tile, _round_up(per_chunk, 8))
    steps = -(-n // (num_chunks * tile_n))                # ceil
    n_pad = num_chunks * steps * tile_n

    # Host-side pack: zero-pad to [n_pad, 16] and cast to bf16 (HBM stream is
    # 32 B/point; padded feature columns hit zero W1 rows, padded points are
    # masked in-kernel).
    # TODO(synk): a lane-dense (feature-major / pre-swizzled) x layout would shrink
    # the VMEM footprint of the streamed tile further, but needs an in-kernel
    # transpose (extra XLU/vext pressure); point-major is kept here.
    xp = jnp.zeros((n_pad, 16), jnp.bfloat16)
    xp = xp.at[:n, :3].set(x.astype(jnp.bfloat16))

    kernel = functools.partial(encoder_kernel, n_total=n, n_padded=n_pad,
                               steps=steps, num_chunks=num_chunks)

    partials = pl.pallas_call(
        kernel,
        out_shape=jax.ShapeDtypeStruct((num_chunks, 8, 128), jnp.float32),
        grid=(num_chunks, steps),
        in_specs=[
            pl.BlockSpec((tile_n, 16), lambda c, i: (c * steps + i, 0)),  # x stream
            pl.BlockSpec((8, 128), lambda c, i: (0, 0)),                  # biases (f32)
            pl.BlockSpec((512, 128), lambda c, i: (0, 0)),                # weights (bf16)
        ],
        out_specs=pl.BlockSpec((1, 8, 128), lambda c, i: (c, 0, 0)),
        scratch_shapes=[pltpu.VMEM((8, 128), jnp.float32)],   # running sum of relu(h3)
        compiler_params=pltpu.CompilerParams(
            dimension_semantics=("parallel", "arbitrary"),    # chunks || , points = reduction
            vmem_limit_bytes=32 * 1024 * 1024,                # safe on v5e/v6e/v7x
        ),
    )(xp, small, big)

    # Tiny epilogue: sum the 8*num_chunks partial fc4 rows (exact recombination).
    return jnp.sum(partials, axis=(0, 1)).reshape(1, 128)


# ---------------------------------------------------------------------------
# Synthetic params + plain-JAX reference
# ---------------------------------------------------------------------------
def init_params(key):
    """Deterministic synthetic weights with the same shapes as the PyTorch module."""
    sizes = [(3, 16), (16, 32), (32, 64), (64, 128)]
    params = []
    for i, (fan_in, fan_out) in enumerate(sizes):
        kw, kb = jax.random.split(jax.random.fold_in(key, i))
        bound = 1.0 / (fan_in ** 0.5)
        w = jax.random.uniform(kw, (fan_in, fan_out), jnp.float32, -bound, bound)
        b = jax.random.uniform(kb, (1, fan_out), jnp.float32, -bound, bound)
        params.append((w, b))
    return params


def encoder_reference(x, params):
    """Plain-JAX f32 reference mirroring the PyTorch forward."""
    h = x
    for i, (w, b) in enumerate(params):
        h = h @ w + b
        if i < len(params) - 1:
            h = jnp.maximum(h, 0.0)
    return jnp.mean(h, axis=0).reshape(1, 128)


if __name__ == "__main__":
    key = jax.random.PRNGKey(0)
    k_x, k_p = jax.random.split(key)

    # N = 8 sparsely-sampled context points, each with 3 features (x, y, value).
    x = jax.random.normal(k_x, (8, 3), jnp.float32)
    params = init_params(k_p)

    out = jax.block_until_ready(encoder_forward(x, params))
    ref = encoder_reference(x, params)
    assert out.shape == (1, 128)
    # bf16 MXU operands -> loosened tolerances vs the f32 reference.
    assert jnp.allclose(out, ref, atol=3e-2, rtol=3e-2), float(jnp.max(jnp.abs(out - ref)))

    # Exercise the multi-step accumulation + padding/mask path at a small size.
    x_big = jax.random.normal(jax.random.fold_in(k_x, 1), (40, 3), jnp.float32)
    out_big = jax.block_until_ready(encoder_forward(x_big, params, max_tile=8))
    ref_big = encoder_reference(x_big, params)
    assert jnp.allclose(out_big, ref_big, atol=3e-2, rtol=3e-2), float(
        jnp.max(jnp.abs(out_big - ref_big)))

    print("KERNEL_OK")
</pallas_src>

<mosaic_0001>
module attributes {stable_mosaic.version = 11 : i64} {
  func.func @encoder_kernel(%arg0: i32, %arg1: i32, %arg2: memref<8x16xbf16, #tpu.memory_space<vmem>>, %arg3: memref<8x128xf32, #tpu.memory_space<vmem>>, %arg4: memref<512x128xbf16, #tpu.memory_space<vmem>>, %arg5: memref<1x8x128xf32, #tpu.memory_space<vmem>>, %arg6: memref<8x128xf32, #tpu.memory_space<vmem>>) attributes {dimension_semantics = [#tpu.dimension_semantics<parallel>, #tpu.dimension_semantics<arbitrary>], iteration_bounds = array<i64: 2, 1>, scalar_prefetch = 0 : i64, scratch_operands = 1 : i64, tpu.core_type = #tpu.core_type<tc>, window_params = [{transform_indices = @transform_0, window_bounds = array<i64: 8, 16>}, {pipeline_mode = #tpu.pipeline_mode<synchronous>, transform_indices = @transform_1, window_bounds = array<i64: 8, 128>}, {pipeline_mode = #tpu.pipeline_mode<synchronous>, transform_indices = @transform_2, window_bounds = array<i64: 512, 128>}, {transform_indices = @transform_3, window_bounds = array<i64: 1, 8, 128>}]} {
    %c0_i32 = arith.constant 0 : i32
    %0 = arith.cmpi eq, %arg1, %c0_i32 : i32
    %1 = arith.extui %0 : i1 to i32
    %c0_i32_0 = arith.constant 0 : i32
    %2 = arith.cmpi ne, %1, %c0_i32_0 : i32
    scf.if %2 {
      %cst_22 = arith.constant 0.000000e+00 : f32
      %46 = vector.broadcast %cst_22 : f32 to vector<8x128xf32>
      %c0_23 = arith.constant 0 : index
      %c0_24 = arith.constant 0 : index
      %47 = vector.load %arg6[%c0_23, %c0_24] : memref<8x128xf32, #tpu.memory_space<vmem>>, vector<8x128xf32>
      tpu.vector_store %arg6[%c0_23, %c0_24], %46 {strides = array<i32>} : memref<8x128xf32, #tpu.memory_space<vmem>>, vector<8x128xf32>,
    } else {
    }
    %c0 = arith.constant 0 : index
    %c0_1 = arith.constant 0 : index
    %3 = vector.load %arg2[%c0, %c0_1] : memref<8x16xbf16, #tpu.memory_space<vmem>>, vector<8x16xbf16>
    %c0_2 = arith.constant 0 : index
    %c0_3 = arith.constant 0 : index
    %4 = vector.load %arg3[%c0_2, %c0_3] : memref<8x128xf32, #tpu.memory_space<vmem>>, vector<8x128xf32>
    %c0_4 = arith.constant 0 : index
    %c0_5 = arith.constant 0 : index
    %5 = vector.load %arg4[%c0_4, %c0_5] : memref<512x128xbf16, #tpu.memory_space<vmem>>, vector<16x128xbf16>
    %cst = arith.constant dense<0.000000e+00> : vector<8x128xf32>
    %6 = tpu.matmul %3, %5, %cst {dimension_numbers = #tpu.dot_dimension_numbers<[1], [0], [0], [1], [0, 0, 1, 1], [], []>} : vector<8x16xbf16>, vector<16x128xbf16>, vector<8x128xf32> -> vector<8x128xf32>
    %7 = vector.extract_strided_slice %4 {offsets = [0, 0], sizes = [1, 128], strides = [1, 1]} : vector<8x128xf32> to vector<1x128xf32>
    %8 = vector.broadcast %7 : vector<1x128xf32> to vector<8x128xf32>
    %9 = arith.addf %6, %8 : vector<8x128xf32>
    %cst_6 = arith.constant 0.000000e+00 : f32
    %10 = vector.broadcast %cst_6 : f32 to vector<8x128xf32>
    %11 = arith.maximumf %9, %10 : vector<8x128xf32>
    %12 = arith.truncf %11 : vector<8x128xf32> to vector<8x128xbf16>
    %c128 = arith.constant 128 : index
    %c0_7 = arith.constant 0 : index
    %13 = vector.load %arg4[%c128, %c0_7] : memref<512x128xbf16, #tpu.memory_space<vmem>>, vector<128x128xbf16>
    %cst_8 = arith.constant dense<0.000000e+00> : vector<8x128xf32>
    %14 = tpu.matmul %12, %13, %cst_8 {dimension_numbers = #tpu.dot_dimension_numbers<[1], [0], [0], [1], [0, 0, 1, 1], [], []>} : vector<8x128xbf16>, vector<128x128xbf16>, vector<8x128xf32> -> vector<8x128xf32>
    %15 = vector.extract_strided_slice %4 {offsets = [1, 0], sizes = [1, 128], strides = [1, 1]} : vector<8x128xf32> to vector<1x128xf32>
    %16 = vector.broadcast %15 : vector<1x128xf32> to vector<8x128xf32>
    %17 = arith.addf %14, %16 : vector<8x128xf32>
    %cst_9 = arith.constant 0.000000e+00 : f32
    %18 = vector.broadcast %cst_9 : f32 to vector<8x128xf32>
    %19 = arith.maximumf %17, %18 : vector<8x128xf32>
    %20 = arith.truncf %19 : vector<8x128xf32> to vector<8x128xbf16>
    %c256 = arith.constant 256 : index
    %c0_10 = arith.constant 0 : index
    %21 = vector.load %arg4[%c256, %c0_10] : memref<512x128xbf16, #tpu.memory_space<vmem>>, vector<128x128xbf16>
    %cst_11 = arith.constant dense<0.000000e+00> : vector<8x128xf32>
    %22 = tpu.matmul %20, %21, %cst_11 {dimension_numbers = #tpu.dot_dimension_numbers<[1], [0], [0], [1], [0, 0, 1, 1], [], []>} : vector<8x128xbf16>, vector<128x128xbf16>, vector<8x128xf32> -> vector<8x128xf32>
    %23 = vector.extract_strided_slice %4 {offsets = [2, 0], sizes = [1, 128], strides = [1, 1]} : vector<8x128xf32> to vector<1x128xf32>
    %24 = vector.broadcast %23 : vector<1x128xf32> to vector<8x128xf32>
    %25 = arith.addf %22, %24 : vector<8x128xf32>
    %cst_12 = arith.constant 0.000000e+00 : f32
    %26 = vector.broadcast %cst_12 : f32 to vector<8x128xf32>
    %27 = arith.maximumf %25, %26 : vector<8x128xf32>
    %c1_i32 = arith.constant 1 : i32
    %28 = arith.muli %arg0, %c1_i32 : i32
    %29 = arith.addi %28, %arg1 : i32
    %c8_i32 = arith.constant 8 : i32
    %30 = arith.muli %29, %c8_i32 : i32
    %31 = tpu.iota {dimensions = array<i32: 0>} : vector<8x128xi32>
    %32 = vector.broadcast %30 : i32 to vector<8x128xi32>
    %33 = arith.addi %31, %32 : vector<8x128xi32>
    %c8_i32_13 = arith.constant 8 : i32
    %34 = vector.broadcast %c8_i32_13 : i32 to vector<8x128xi32>
    %35 = arith.cmpi slt, %33, %34 : vector<8x128xi32>
    %cst_14 = arith.constant 0.000000e+00 : f32
    %36 = vector.broadcast %cst_14 : f32 to vector<8x128xf32>
    %37 = arith.select %35, %27, %36 : vector<8x128xi1>, vector<8x128xf32>
    %c0_15 = arith.constant 0 : index
    %c0_16 = arith.constant 0 : index
    %38 = vector.load %arg6[%c0_15, %c0_16] : memref<8x128xf32, #tpu.memory_space<vmem>>, vector<8x128xf32>
    %39 = vector.shape_cast %37 : vector<8x128xf32> to vector<1x8x128xf32>
    %cst_17 = arith.constant dense<0.000000e+00> : vector<8x128xf32>
    %40 = vector.multi_reduction <add>, %39, %cst_17 [0] : vector<1x8x128xf32> to vector<8x128xf32>
    %41 = arith.addf %38, %40 : vector<8x128xf32>
    %c0_18 = arith.constant 0 : index
    %c0_19 = arith.constant 0 : index
    %42 = vector.load %arg6[%c0_18, %c0_19] : memref<8x128xf32, #tpu.memory_space<vmem>>, vector<8x128xf32>
    tpu.vector_store %arg6[%c0_18, %c0_19], %41 {strides = array<i32>} : memref<8x128xf32, #tpu.memory_space<vmem>>, vector<8x128xf32>,
    %c0_i32_20 = arith.constant 0 : i32
    %43 = arith.cmpi eq, %arg1, %c0_i32_20 : i32
    %44 = arith.extui %43 : i1 to i32
    %c0_i32_21 = arith.constant 0 : i32
    %45 = arith.cmpi ne, %44, %c0_i32_21 : i32
    scf.if %45 {
      %c0_22 = arith.constant 0 : index
      %c0_23 = arith.constant 0 : index
      %46 = vector.load %arg6[%c0_22, %c0_23] : memref<8x128xf32, #tpu.memory_space<vmem>>, vector<8x128xf32>
      %cst_24 = arith.constant 1.250000e-01 : f32
      %47 = vector.broadcast %cst_24 : f32 to vector<8x128xf32>
      %48 = arith.mulf %46, %47 : vector<8x128xf32>
      %49 = arith.truncf %48 : vector<8x128xf32> to vector<8x128xbf16>
      %c384 = arith.constant 384 : index
      %c0_25 = arith.constant 0 : index
      %50 = vector.load %arg4[%c384, %c0_25] : memref<512x128xbf16, #tpu.memory_space<vmem>>, vector<128x128xbf16>
      %cst_26 = arith.constant dense<0.000000e+00> : vector<8x128xf32>
      %51 = tpu.matmul %49, %50, %cst_26 {dimension_numbers = #tpu.dot_dimension_numbers<[1], [0], [0], [1], [0, 0, 1, 1], [], []>} : vector<8x128xbf16>, vector<128x128xbf16>, vector<8x128xf32> -> vector<8x128xf32>
      %52 = vector.extract_strided_slice %4 {offsets = [3, 0], sizes = [1, 128], strides = [1, 1]} : vector<8x128xf32> to vector<1x128xf32>
      %cst_27 = arith.constant 6.250000e-02 : f32
      %53 = vector.broadcast %cst_27 : f32 to vector<1x128xf32>
      %54 = arith.mulf %52, %53 : vector<1x128xf32>
      %55 = vector.broadcast %54 : vector<1x128xf32> to vector<8x128xf32>
      %56 = arith.addf %51, %55 : vector<8x128xf32>
      %c0_28 = arith.constant 0 : index
      %c0_29 = arith.constant 0 : index
      %c0_30 = arith.constant 0 : index
      %57 = vector.load %arg5[%c0_28, %c0_29, %c0_30] : memref<1x8x128xf32, #tpu.memory_space<vmem>>, vector<1x8x128xf32>
      %58 = vector.shape_cast %57 : vector<1x8x128xf32> to vector<8x128xf32>
      %59 = vector.shape_cast %56 : vector<8x128xf32> to vector<1x8x128xf32>
      tpu.vector_store %arg5[%c0_28, %c0_29, %c0_30], %59 {strides = array<i32>} : memref<1x8x128xf32, #tpu.memory_space<vmem>>, vector<1x8x128xf32>,
    } else {
    }
    return
  }
  func.func @transform_0(%arg0: i32, %arg1: i32) -> (i32, i32) {
    %c1_i32 = arith.constant 1 : i32
    %0 = arith.muli %arg0, %c1_i32 : i32
    %1 = arith.addi %0, %arg1 : i32
    %c0_i32 = arith.constant 0 : i32
    %c0_i32_0 = arith.constant 0 : i32
    return %1, %c0_i32 : i32, i32
  }
  func.func @transform_1(%arg0: i32, %arg1: i32) -> (i32, i32) {
    %c0_i32 = arith.constant 0 : i32
    %c0_i32_0 = arith.constant 0 : i32
    %c0_i32_1 = arith.constant 0 : i32
    return %c0_i32, %c0_i32_0 : i32, i32
  }
  func.func @transform_2(%arg0: i32, %arg1: i32) -> (i32, i32) {
    %c0_i32 = arith.constant 0 : i32
    %c0_i32_0 = arith.constant 0 : i32
    %c0_i32_1 = arith.constant 0 : i32
    return %c0_i32, %c0_i32_0 : i32, i32
  }
  func.func @transform_3(%arg0: i32, %arg1: i32) -> (i32, i32, i32) {
    %c0_i32 = arith.constant 0 : i32
    %c0_i32_0 = arith.constant 0 : i32
    %c0_i32_1 = arith.constant 0 : i32
    return %arg0, %c0_i32, %c0_i32_0 : i32, i32, i32
  }
}

</mosaic_0001>

<bundles_post_ra>
// kernel: tpu_custom_call.1
= control target key start
LH: loop header
LB: loop body
LE: loop exit
PB: predicated region body
PF: predicated region fallthrough
CT: control target
= control target key end

     0   :  { %8 = vsyncpa [#allocation4], 0  ;;  %s1220_s0 = inlined_call_operand.hbm [shape: bf16[16,16], index: 0, kind: input, shape index: {}]   ;;  %s1221_s1 = inlined_call_operand.hbm [shape: f32[8,128], index: 1, kind: input, shape index: {}]   ;;  %s1222_s2 = inlined_call_operand.hbm [shape: bf16[512,128], index: 2, kind: input, shape index: {}]   ;;  %s1223_s3 = inlined_call_operand.hbm [shape: f32[2,8,128], index: 3, kind: output, shape index: {}]  }
   0x1   :  { %10 = vsyncpa [#allocation4 + $0x1], 0 }
   0x2   :  { %11 = vsyncpa [#allocation7], 0 }
   0x3   :  { %12 = vsyncpa [#allocation5], 0 }
   0x4   :  { %14 = vsyncpa [#allocation5 + $0x1], 0  ;;  %s1073_s12 = smov 0   ;;  %s1075_s13 = smov 0  }
   0x5   :  { %s1077_s14 = smov 0   ;;  %s1079_s15 = smov 0  }
   0x6   :  { %s1081_s16 = smov 0   ;;  %s1083_s17 = smov 0  }
   0x7 LB: > { %s642_s18 = sadd.s32 4294967295, %s1047_s17   ;;  %s643_s19 = sadd.s32 4294967294, %s1047_s17   ;;  %s1047_s17 = sphi %s1083_s17, %s20_s17   ;;  %s1043_s16 = sphi %s1081_s16, %s1233_s16   ;;  %s1039_s15 = sphi %s1079_s15, %s1232_s15   ;;  %s1035_s14 = sphi %s1077_s14, %s1231_s14   ;;  %s1031_s13 = sphi %s1075_s13, %s1230_s13   ;;  %s1027_s12 = sphi %s1073_s12, %s1229_s12  }
   0x8   : > { %p54_p0 = scmp.ne.s32.totalorder %s1031_s13, %s1027_s12  ;;  %p1109_p1 = scmp.eq.s32.totalorder %s642_s18, 0 }
   0x9   : > { %p126_p2 = scmp.eq.s32.totalorder %s643_s19, 1  ;;  %p644_p4 = scmp.ge.s32.totalorder %s1047_s17, 1 }
   0xa   : > { %p1115_p3 = por %p1109_p1, %p54_p0  ;;  %p133_p6 = scmp.lt.s32.totalorder %s1047_s17, 3 }
   0xb   : > { %p1120_p5 = por %p126_p2, %p54_p0  ;;  %s145_s25 = sshll.u32 %s1221_s1, 4  ;;  %s146_s25 = int_to_ptr.hbm [resolvable:$true] %s145_s25 }
   0xc   : > { %p1128_p7 = pnand %p644_p4, %p133_p6  ;;  %p647_p8 = scmp.ge.s32.totalorder %s1047_s17, 2 }
   0xd   : > { %s1049_s27 = smov [#allocation6]   ;;  %s156_s4 = sshll.u32 %s1222_s2, 4  ;;  %s157_s4 = int_to_ptr.hbm [resolvable:$true] %s156_s4 }
   0xe   : > { %p798_p9 = pneg %p1128_p7  ;;  %s147_s28 = sshll.u32 %s1049_s27, 4  ;;  %s148_s28 = int_to_ptr.vmem [resolvable:$true] %s147_s28 }
   0xf   : > { %s1050_s5 = smov [#allocation8]   ;;  %s1051_s7 = smov 64  }
  0x10   : > { %p799_p10 = pnand %p798_p9, %p1109_p1  ;;  %s158_s6 = sshll.u32 %s1050_s5, 4  ;;  %s159_s6 = int_to_ptr.vmem [resolvable:$true] %s158_s6 }
  0x11   : > { %s1052_s8 = smov 4   ;;  %p120_p11 = scmp.eq.s32.totalorder %s642_s18, 1 }
  0x12   : > { %801 = dma.hbm_to_vmem [thread:$0]  (!%p799_p10), %s146_s25, 128, %s148_s28, [#allocation7]  }
  0x13   : > { %804 = dma.hbm_to_vmem [thread:$0]  (!%p799_p10), %s157_s4, 4096, %s159_s6, [#allocation7], %s1051_s7, %s1051_s7, %s1052_s8  }
  0x14   : > { %s32_s9 = sadd.s32 1, %s1043_s16  ;;  %s41_s10 = sadd.s32 1, %s1035_s14 }
  0x15   : > { %p34_p12 = scmp.ge.s32.totalorder %s32_s9, 2  ;;  %p48_p13 = scmp.ne.s32.totalorder %s1035_s14, %s1031_s13 }
  0x16   : > { %p49_p0 = scmp.eq.s32.totalorder %s1047_s17, 0  ;;  %p815_p4 = scmp.lt.s32.totalorder %s1047_s17, 2 }
  0x17   : > { %s1235_s9 = smov (%p34_p12, %s32_s9), 0  ;;  %p1149_p2 = por %p120_p11, %p48_p13 }
  0x18   : > { %s38_s19 = ssub.s32 %s1043_s16, %s1235_s9  ;;  %s172_s23 = sand.u32 1, %s1035_s14  }
  0x19   : > { %p39_p6 = scmp.eq.s32.totalorder %s38_s19, 0  ;;  %p50_p9 = por %p49_p0, %p48_p13 }
  0x1a   : > { %s648_s24 = sshll.u32 %s172_s23, 2  ;;  %s649_s18 = sshll.u32 %s1043_s16, 2 }
  0x1b   : > { %s1159_s25 = scalar_select %p39_p6, %s1035_s14, %s41_s10  }
  0x1c   : > { %s181_s29 = scalar_lea.hbm %s1220_s0, %s649_s18  ;;  %s176_s4 = scalar_lea.vmem [#allocation3], %s648_s24 }
  0x1d   : > { %s183_s30 = sshll.u32 %s181_s29, 4  ;;  %s185_s5 = sshll.u32 %s176_s4, 4  ;;  %s184_s30 = int_to_ptr.hbm [resolvable:$true] %s183_s30  ;;  %s186_s5 = int_to_ptr.vmem [resolvable:$true] %s185_s5 }
  0x1e   : > { %p806_p10 = pnand %p815_p4, %p50_p9  ;;  %s173_s6 = scalar_lea.sflag [#allocation4], %s172_s23 }
  0x1f   : > { %194 = sbr.rel (%p1128_p7) target bundleno = 588 (0x24c), region = 32  ;;  %s1169_s7 = sand.u32 (!%p1128_p7), 1, %s1031_s13  }
  0x20   : > { %808 = dma.hbm_to_vmem [thread:$0]  (!%p806_p10), %s184_s30, 64, %s186_s5, %s173_s6  }
  0x21   : > { %s651_s8 = sshll.u32 (!%p1128_p7), %s1169_s7, 2  ;;  %s197_s10 = scalar_lea.sflag (!%p1128_p7), [#allocation4], %s1169_s7 }
  0x22   : > { %s200_s19 = scalar_lea.vmem (!%p1128_p7), [#allocation3], %s651_s8 }
  0x24   : > { %1014 = dma.done.wait (%p1115_p3), %s197_s10, 64  }
  0x25   : > { %1016 = vsyncadd (%p1115_p3), %s197_s10, 4294967232 }
  0x26   : > { %1018 = dma.done.wait (%p1109_p1), [#allocation7], 4224  }
  0x27   : > { %1020 = vsyncadd (%p1109_p1), [#allocation7], 4294963072  ;;  %v761_v0 = vld [vmem:[#allocation8] sm:$0xff]  ;;  %v769_v1 = vld [vmem:[#allocation8 + $0x78] sm:$0xff]  ;;  %vm252_vm0 = vcmask 130048   ;;  %v432_v39 = vlaneseq  ;;  %s724_s20 = sshll.u32 %s1039_s15, 3 }
  0x28   : > { %263 = vmatpush.bf16.msra.mxu0 %v761_v0  ;;  %v241_v2 = vld [vmem:[%s200_s19] sm:$0xf]  ;;  %336 = vmatpush.bf16.msra.mxu1 %v769_v1  ;;  %v767_v4 = vld [vmem:[#allocation8 + $0x68] sm:$0xff]  ;;  %v766_v5 = vld [vmem:[#allocation8 + $0x60] sm:$0xff]  ;;  %v434_v41 = vstv %s724_s20  ;;  %s654_s21 = sshll.u32 %s1169_s7, 3  ;;  %s539_s15 = scalar_lea.hbm %s1223_s3, %s724_s20 }
  0x29   : > { %v768_v3 = vld [vmem:[#allocation8 + $0x70] sm:$0xff]  ;;  %v765_v6 = vld [vmem:[#allocation8 + $0x58] sm:$0xff]  ;;  %v763_v8 = vld [vmem:[#allocation8 + $0x48] sm:$0xff]  ;;  %v433_v40 = vshrl.u32 %v432_v39, 7  ;;  %s233_s24 = scalar_lea.vmem [#allocation9], %s654_s21  ;;  %s543_s27 = sshll.u32 %s539_s15, 4  ;;  %s544_s27 = int_to_ptr.hbm [resolvable:$true] %s543_s27 }
  0x2a   : > { %v764_v7 = vld [vmem:[#allocation8 + $0x50] sm:$0xff]  ;;  %v762_v9 = vld [vmem:[#allocation8 + $0x40] sm:$0xff]  ;;  %v777_v10 = vld [vmem:[#allocation8 + $0xb8] sm:$0xff]  ;;  %s541_s18 = sshll.u32 %s233_s24, 4  ;;  %s529_s28 = scalar_lea.sflag [#allocation5], %s1169_s7  ;;  %s542_s18 = int_to_ptr.vmem [resolvable:$true] %s541_s18 }
  0x2b   : > { %659 = vmatmul.msk.bf16.vlgmr.msra.gmra.mxu0 %vm252_vm0, %v241_v2  ;;  %416 = vmatpush.bf16.msra.mxu2 %v777_v10  ;;  %v776_v11 = vld [vmem:[#allocation8 + $0xb0] sm:$0xff]  ;;  %v775_v12 = vld [vmem:[#allocation8 + $0xa8] sm:$0xff]  ;;  %v774_v13 = vld [vmem:[#allocation8 + $0xa0] sm:$0xff]  ;;  %v435_v43 = vadd.s32 %v434_v41, %v433_v40  ;;  %s975_s29 = sshra.s32 %s544_s27, 4  ;;  %s981_s6 = scalar_lea.hbm %s1223_s3, 16  ;;  %s976_s29 = int_to_ptr.hbm [resolvable:$true] %s975_s29 }
  0x2c   : > { %337 = vmatpush.bf16.msra.mxu1 %v768_v3  ;;  %v773_v14 = vld [vmem:[#allocation8 + $0x98] sm:$0xff]  ;;  %v772_v16 = vld [vmem:[#allocation8 + $0x90] sm:$0xff]  ;;  %v771_v23 = vld [vmem:[#allocation8 + $0x88] sm:$0xff]  ;;  %s977_s30 = scalar_lea.hbm %s976_s29, 8  ;;  %p982_p11 = scmp.lt.s32.totalorder %s976_s29, %s1223_s3 }
  0x2d   : > { %v242_v15 = vld [vmem:[#allocation6] sm:$0xff]  ;;  %v770_v24 = vld [vmem:[#allocation8 + $0x80] sm:$0xff]  ;;  %v784_v26 = vld [vmem:[#allocation8 + $0xf0] sm:$0xff]  ;;  %vm436_vm1 = vcmp.lt.s32.totalorder %v435_v43, 8  ;;  %p978_p1 = scmp.ne.s32.totalorder %s976_s29, %s977_s30  ;;  %p983_p12 = scmp.lt.s32.totalorder %s981_s6, %s977_s30 }
  0x2e   : > { %v245_v17 = vperm.slane %v242_v15, 0  ;;  %v785_v25 = vld [vmem:[#allocation8 + $0xf8] sm:$0xff]  ;;  %v783_v27 = vld [vmem:[#allocation8 + $0xe8] sm:$0xff]  ;;  %v782_v28 = vld [vmem:[#allocation8 + $0xe0] sm:$0xff]  ;;  %v287_v31 = vperm.slane %v242_v15, 1  ;;  %v367_v42 = vperm.slane %v242_v15, 2 }
  0x2f   : > { %417 = vmatpush.bf16.msra.mxu2 %v776_v11  ;;  %514 = vmatpush.bf16.msra.mxu3 %v785_v25  ;;  %v781_v29 = vld [vmem:[#allocation8 + $0xd8] sm:$0xff]  ;;  %v780_v30 = vld [vmem:[#allocation8 + $0xd0] sm:$0xff]  ;;  %v779_v37 = vld [vmem:[#allocation8 + $0xc8] sm:$0xff]  ;;  %v464_v51 = vmul.f32 0.0625, %v242_v15  ;;  %p979_p3 = pnand %p978_p1, %p1149_p2  ;;  %p984_p13 = por %p983_p12, %p982_p11 }
  0x30   : > { %338 = vmatpush.bf16.msra.mxu1 %v767_v4  ;;  %v778_v38 = vld [vmem:[#allocation8 + $0xc0] sm:$0xff] }
  0x31   : > { %v465_v52 = vperm.slane %v464_v51, 3  ;;  %p980_p7 = pneg %p979_p3 }
  0x33   : > { %418 = vmatpush.bf16.msra.mxu2 %v775_v12  ;;  %515 = vmatpush.bf16.msra.mxu3 %v784_v26  ;;  %p985_p0 = pnand %p984_p13, %p980_p7 }
  0x34   : > { %339 = vmatpush.bf16.msra.mxu1 %v766_v5 }
  0x37   : > { %419 = vmatpush.bf16.msra.mxu2 %v774_v13  ;;  %516 = vmatpush.bf16.msra.mxu3 %v783_v27 }
  0x38   : > { %340 = vmatpush.bf16.msra.mxu1 %v765_v6 }
  0x3b   : > { %420 = vmatpush.bf16.msra.mxu2 %v773_v14  ;;  %517 = vmatpush.bf16.msra.mxu3 %v782_v28 }
  0x3c   : > { %341 = vmatpush.bf16.msra.mxu1 %v764_v7 }
  0x3f   : > { %421 = vmatpush.bf16.msra.mxu2 %v772_v16  ;;  %518 = vmatpush.bf16.msra.mxu3 %v781_v29 }
  0x40   : > { %342 = vmatpush.bf16.msra.mxu1 %v763_v8 }
  0x43   : > { %422 = vmatpush.bf16.msra.mxu2 %v771_v23  ;;  %519 = vmatpush.bf16.msra.mxu3 %v780_v30 }
  0x44   : > { %343 = vmatpush.bf16.msra.mxu1 %v762_v9 }
  0x47   : > { %423 = vmatpush.bf16.msra.mxu2 %v770_v24  ;;  %520 = vmatpush.bf16.msra.mxu3 %v779_v37 }
  0x4b   : > { %521 = vmatpush.bf16.msra.mxu3 %v778_v38 }
  0xa8   : > { %v265_v18 = vpop.f32.mrf.mxu0 }
  0xa9   : > { %v266_v19 = vadd.f32 %v265_v18, %v245_v17 }
  0xab   : > { %v269_v20 = vmax.f32 %v266_v19, 0.0 }
  0xad   : > { %v270_v21 = vpack.c.bf16 %v269_v20, %v269_v20 }
  0xaf   : > { %344 = vmatmul.bf16.vlgmr.msra.gmra.mxu1 %v270_v21 }
  0xb0   : > { %v267_v22 = vpop.f32.mrf.mxu0 }
 0x12c   : > { %v345_v32 = vpop.f32.mrf.mxu1 }
 0x12d   : > { %v346_v33 = vadd.f32 %v345_v32, %v287_v31 }
 0x12f   : > { %v349_v34 = vmax.f32 %v346_v33, 0.0 }
 0x131   : > { %v350_v35 = vpack.c.bf16 %v349_v34, %v349_v34 }
 0x133   : > { %424 = vmatmul.bf16.vlgmr.msra.gmra.mxu2 %v350_v35 }
 0x134   : > { %v347_v36 = vpop.f32.mrf.mxu1 }
 0x1b6   : > { %v425_v44 = vpop.f32.mrf.mxu2 }
 0x1b7   : > { %v426_v45 = vadd.f32 %v425_v44, %v367_v42 }
 0x1b9   : > { %v429_v46 = vmax.f32 %v426_v45, 0.0 }
 0x1bb   : > { %v437_v47 = vsel %vm436_vm1, %v429_v46, 0.0 }
 0x1bc   : > { %v446_v48 = vmul.f32 0.125, %v437_v47 }
 0x1be   : > { %v427_v49 = vpop.f32.mrf.mxu2  ;;  %v447_v50 = vpack.c.bf16 %v446_v48, %v446_v48 }
 0x1c0   : > { %522 = vmatmul.bf16.vlgmr.msra.gmra.mxu3 %v447_v50 }
 0x243   : > { %v523_v53 = vpop.f32.mrf.mxu3 }
 0x244   : > { %v524_v54 = vadd.f32 %v523_v53, %v465_v52 }
 0x246   : > { %527 = vst [vmem:[%s233_s24] sm:$0xff] %v524_v54 }
 0x247   : > { %988 = shalt.err (!%p985_p0)
}
 0x248   : > { %796 = dma.vmem_to_hbm [thread:$0]  (%p1149_p2), %s542_s18, 128, %s544_s27, %s529_s28  }
 0x24b   : > { %v525_v55 = vpop.f32.mrf.mxu3 }
 0x24c PF: > { %s555_s7 = sand.u32 1, %s1027_s12   ;;  %p810_p4 = pnand %p647_p8, %p1120_p5 }
 0x24d   : > { %s556_s19 = scalar_lea.sflag [#allocation5], %s555_s7 }
 0x24e   : > { %p811_p6 = pneg %p810_p4 }
 0x250   : > { %1022 = dma.done.wait (%p811_p6), %s556_s19, 128  }
 0x251   : > { %1024 = vsyncadd (%p811_p6), %s556_s19, 4294967168  ;;  %s20_s17 = sadd.s32 1, %s1047_s17   ;;  %s1229_s12 = smov %s1031_s13 }
 0x252   : > { %p17_p9 = scmp.ge.s32.totalorder %s20_s17, 4   ;;  %s1230_s13 = smov %s1035_s14 }
 0x253   : > { %s1231_s14 = smov %s1159_s25  ;;  %s1232_s15 = smov %s1043_s16 }
 0x254   : > { %s1233_s16 = smov %s1235_s9  ;;  %19 = sbr.rel (!%p17_p9) target bundleno = 7 (0x7), region = 93 }
 0x259   :  { %562 = vsyncpa [#allocation4], 1 }
 0x25a   :  { %564 = vsyncpa [#allocation4 + $0x1], 1 }
 0x25b   :  { %565 = vsyncpa [#allocation7], 1 }
 0x25c   :  { %566 = vsyncpa [#allocation5], 1 }
 0x25d   :  { %568 = vsyncpa [#allocation5 + $0x1], 1 }

</bundles_post_ra>
